<compile_context>
chip_gen: v7x
topology: tpu7x:2x2x1
jax: 0.10.0
libtpu: 0.0.40
codegen_flags: <defaults>
</compile_context>

<pallas_src>
import functools

import jax
import jax.numpy as jnp
from jax.experimental import pallas as pl
from jax.experimental.pallas import tpu as pltpu


def _ffn_kernel(x_ref, w13_ref, w2_ref, o_ref, acc_ref, *, tn_h):
    # x_ref:   (tm, dim)        token tile (constant along the hidden axis)
    # w13_ref: (dim, 2*tn_h)    fused [gate | up] projection slice (contiguous tile)
    # w2_ref:  (tn_h, dim)      down-projection row slice (contiguous tile)
    # o_ref:   (tm, dim)        output tile (revisited across the hidden axis)
    # acc_ref: (tm, dim) f32    VMEM accumulator
    k = pl.program_id(1)

    x = x_ref[...]
    # One MXU pass produces both projections: (tm, 2*tn_h), f32 accumulation.
    h13 = jnp.dot(x, w13_ref[...], preferred_element_type=jnp.float32)
    h1 = h13[:, :tn_h]
    h3 = h13[:, tn_h:]
    gated = (h1 * jax.nn.sigmoid(h1)) * h3          # SiLU(h1) * h3 on VPU/EUP (f32)
    partial = jnp.dot(gated.astype(w2_ref.dtype), w2_ref[...],
                      preferred_element_type=jnp.float32)

    @pl.when(k == 0)
    def _():
        acc_ref[...] = partial                      # first step: write, no zero-init

    @pl.when(k > 0)
    def _():
        acc_ref[...] += partial

    @pl.when(k == pl.num_programs(1) - 1)
    def _():
        o_ref[...] = acc_ref[...].astype(o_ref.dtype)


def _round_up(x, m):
    return ((x + m - 1) // m) * m


def _pick_hidden_tile(hidden, tn_h):
    """Largest lane-aligned tile <= tn_h that evenly divides hidden."""
    if hidden <= tn_h:
        return hidden
    cand = (min(tn_h, hidden) // 128) * 128
    while cand >= 128:
        if hidden % cand == 0:
            return cand
        cand -= 128
    return hidden  # no lane-aligned divisor <= tn_h -> keep full hidden resident


@functools.lru_cache(maxsize=1)
def _vmem_physical_bytes():
    try:
        return int(pltpu.get_tpu_info().vmem_capacity_bytes)
    except Exception:
        # Conservative (v7x-sized) fallback if the query is unavailable.
        return 64 << 20


def prepare_weights(w1, w2, w3, dtype=jnp.bfloat16, tn_h=512):
    """One-time weight prep (do NOT call per forward).

    Inputs use the PyTorch nn.Linear layout (out, in).
    Returns:
      w13: (hidden//tn, dim, 2*tn) bf16 -- per-hidden-tile [w1.T_k | w3.T_k], contiguous
      w2t: (hidden//tn, tn, dim)   bf16 -- per-hidden-tile rows of w2.T, contiguous
    """
    hidden, dim = w1.shape
    tn = _pick_hidden_tile(hidden, tn_h)
    n_k = hidden // tn
    w1t = jnp.asarray(w1.T, dtype=dtype).reshape(dim, n_k, tn).transpose(1, 0, 2)
    w3t = jnp.asarray(w3.T, dtype=dtype).reshape(dim, n_k, tn).transpose(1, 0, 2)
    w13 = jnp.concatenate([w1t, w3t], axis=-1)            # (n_k, dim, 2*tn)
    w2t = jnp.asarray(w2.T, dtype=dtype).reshape(n_k, tn, dim)
    return w13, w2t


@functools.partial(jax.jit, static_argnames=("tm",))
def feed_forward(x, w13, w2t, *, tm=512):
    """x: (B, S, dim). w13: (n_k, dim, 2*tn); w2t: (n_k, tn, dim) -- prepared layout.

    tm is the per-generation roofline knob (v6e: 512-1024; v7x: ~512 per TC;
    v5e: 256 is already near MXU-bound).  It is auto-shrunk if the footprint
    would exceed the device's physical VMEM.
    """
    B, S, dim = x.shape
    n_k, _, two_tn = w13.shape
    tn = two_tn // 2
    hidden = n_k * tn
    M = B * S

    compute_dtype = w13.dtype
    x2d = x.reshape(M, dim).astype(compute_dtype)

    itemsize = jnp.dtype(compute_dtype).itemsize
    out_itemsize = jnp.dtype(x.dtype).itemsize

    # --- pick the M tile ---------------------------------------------------
    tm_eff = min(tm, _round_up(M, 8))
    if M >= 512:
        # Keep >= 2 M tiles for long sequences so the "parallel" axis feeds
        # both v7x TensorCores.
        tm_eff = min(tm_eff, _round_up(-(-M // 2), 8))

    vmem_budget = _vmem_physical_bytes() - (8 << 20)   # headroom for compiler scratch

    def footprint(tm_e):
        return (2 * tm_e * dim * itemsize            # x (double-buffered)
                + 2 * tm_e * dim * out_itemsize      # out (double-buffered)
                + 2 * dim * 2 * tn * itemsize        # fused w13 tiles (double-buffered)
                + 2 * tn * dim * itemsize            # w2 tiles (double-buffered)
                + tm_e * dim * 4                     # f32 accumulator
                + 3 * tm_e * tn * 4                  # h13 / gated temporaries
                + tm_e * dim * 4)                    # partial-product temporary

    # Shrink tm (the intensity knob) only when the footprint cannot fit.
    while tm_eff > 128 and int(footprint(tm_eff) * 1.4) > vmem_budget:
        tm_eff = max(128, _round_up(tm_eff // 2, 8))

    grid = (pl.cdiv(M, tm_eff), n_k)

    vmem_limit = int(min(vmem_budget,
                         max(32 << 20, int(footprint(tm_eff) * 1.4) + (8 << 20))))

    weight_bytes = (w13.size + w2t.size) * itemsize
    cost = pl.CostEstimate(
        flops=6 * M * dim * hidden,                  # three (M, dim, hidden) matmuls
        transcendentals=M * hidden,                  # sigmoid
        bytes_accessed=(M * dim * itemsize
                        + grid[0] * weight_bytes     # weights re-streamed per M tile
                        + M * dim * out_itemsize))

    kernel = functools.partial(_ffn_kernel, tn_h=tn)

    out2d = pl.pallas_call(
        kernel,
        out_shape=jax.ShapeDtypeStruct((M, dim), x.dtype),
        grid_spec=pltpu.PrefetchScalarGridSpec(
            num_scalar_prefetch=0,
            grid=grid,
            in_specs=[
                pl.BlockSpec((tm_eff, dim), lambda i, k: (i, 0)),              # x tile
                pl.BlockSpec((None, dim, 2 * tn), lambda i, k: (k, 0, 0)),     # fused w1|w3
                pl.BlockSpec((None, tn, dim), lambda i, k: (k, 0, 0)),         # w2 tile
            ],
            out_specs=pl.BlockSpec((tm_eff, dim), lambda i, k: (i, 0)),
            scratch_shapes=[pltpu.VMEM((tm_eff, dim), jnp.float32)],
        ),
        compiler_params=pltpu.CompilerParams(
            dimension_semantics=("parallel", "arbitrary"),
            vmem_limit_bytes=vmem_limit),
        cost_estimate=cost,
    )(x2d, w13, w2t)
    return out2d.reshape(B, S, dim)


def llama_hidden_dim(dim, multiple_of=256, ffn_dim_multiplier=None):
    hidden_dim = 4 * dim
    hidden_dim = int(2 * hidden_dim / 3)
    if ffn_dim_multiplier is not None:
        hidden_dim = int(ffn_dim_multiplier * hidden_dim)
    hidden_dim = multiple_of * ((hidden_dim + multiple_of - 1) // multiple_of)
    return hidden_dim


if __name__ == "__main__":
    # Small, TPU-friendly shapes consistent with the module.
    dim = 128
    multiple_of = 256
    hidden = llama_hidden_dim(dim, multiple_of)  # -> 512
    B, S = 2, 8

    key = jax.random.PRNGKey(0)
    kx, k1, k2, k3 = jax.random.split(key, 4)
    x = jax.random.normal(kx, (B, S, dim), dtype=jnp.float32)
    # PyTorch nn.Linear weight layout: (out, in).
    w1 = jax.random.normal(k1, (hidden, dim), dtype=jnp.float32) * (1.0 / dim) ** 0.5
    w2 = jax.random.normal(k2, (dim, hidden), dtype=jnp.float32) * (1.0 / hidden) ** 0.5
    w3 = jax.random.normal(k3, (hidden, dim), dtype=jnp.float32) * (1.0 / dim) ** 0.5

    # One-time weight prep (hoisted out of the hot path): transpose, fuse w1/w3,
    # pre-tile the hidden axis, cast to bf16.
    w13, w2t = prepare_weights(w1, w2, w3, dtype=jnp.bfloat16)

    out = feed_forward(x, w13, w2t)
    out = jax.block_until_ready(out)

    # Reference in plain JAX with the same dtype plumbing (bf16 operands, f32 accumulate).
    xb = x.reshape(B * S, dim).astype(jnp.bfloat16).astype(jnp.float32)
    w1f = w1.T.astype(jnp.bfloat16).astype(jnp.float32)
    w2f = w2.T.astype(jnp.bfloat16).astype(jnp.float32)
    w3f = w3.T.astype(jnp.bfloat16).astype(jnp.float32)
    h1 = xb @ w1f
    h3 = xb @ w3f
    gated = (h1 * jax.nn.sigmoid(h1)) * h3
    ref = (gated.astype(jnp.bfloat16).astype(jnp.float32) @ w2f).reshape(B, S, dim)

    assert out.shape == (B, S, dim)
    assert jnp.allclose(out, ref, atol=2e-2, rtol=2e-2), float(jnp.max(jnp.abs(out - ref)))

    print("KERNEL_OK")
</pallas_src>

<mosaic_0001>
module attributes {stable_mosaic.version = 11 : i64} {
  func.func @_ffn_kernel(%arg0: i32, %arg1: i32, %arg2: memref<16x128xbf16, #tpu.memory_space<vmem>>, %arg3: memref<1x128x1024xbf16, #tpu.memory_space<vmem>>, %arg4: memref<1x512x128xbf16, #tpu.memory_space<vmem>>, %arg5: memref<16x128xf32, #tpu.memory_space<vmem>>, %arg6: memref<16x128xf32, #tpu.memory_space<vmem>>) attributes {dimension_semantics = [#tpu.dimension_semantics<parallel>, #tpu.dimension_semantics<arbitrary>], iteration_bounds = array<i64: 1, 1>, scalar_prefetch = 0 : i64, scratch_operands = 1 : i64, tpu.core_type = #tpu.core_type<tc>, window_params = [{transform_indices = @transform_0, window_bounds = array<i64: 16, 128>}, {transform_indices = @transform_1, window_bounds = array<i64: 1, 128, 1024>}, {transform_indices = @transform_2, window_bounds = array<i64: 1, 512, 128>}, {transform_indices = @transform_3, window_bounds = array<i64: 16, 128>}]} {
    %c0 = arith.constant 0 : index
    %c0_0 = arith.constant 0 : index
    %0 = vector.load %arg2[%c0, %c0_0] : memref<16x128xbf16, #tpu.memory_space<vmem>>, vector<16x128xbf16>
    %c0_1 = arith.constant 0 : index
    %c0_2 = arith.constant 0 : index
    %c0_3 = arith.constant 0 : index
    %1 = vector.load %arg3[%c0_1, %c0_2, %c0_3] : memref<1x128x1024xbf16, #tpu.memory_space<vmem>>, vector<1x128x1024xbf16>
    %2 = vector.shape_cast %1 : vector<1x128x1024xbf16> to vector<128x1024xbf16>
    %cst = arith.constant dense<0.000000e+00> : vector<16x1024xf32>
    %3 = tpu.matmul %0, %2, %cst {dimension_numbers = #tpu.dot_dimension_numbers<[1], [0], [0], [1], [0, 0, 1, 1], [], []>} : vector<16x128xbf16>, vector<128x1024xbf16>, vector<16x1024xf32> -> vector<16x1024xf32>
    %4 = vector.extract_strided_slice %3 {offsets = [0, 0], sizes = [16, 512], strides = [1, 1]} : vector<16x1024xf32> to vector<16x512xf32>
    %5 = vector.extract_strided_slice %3 {offsets = [0, 512], sizes = [16, 512], strides = [1, 1]} : vector<16x1024xf32> to vector<16x512xf32>
    %6 = arith.negf %4 : vector<16x512xf32>
    %7 = math.exp %6 : vector<16x512xf32>
    %cst_4 = arith.constant 1.000000e+00 : f32
    %8 = vector.broadcast %cst_4 : f32 to vector<16x512xf32>
    %9 = arith.addf %8, %7 : vector<16x512xf32>
    %10 = arith.divf %8, %9 : vector<16x512xf32>
    %11 = arith.mulf %4, %10 : vector<16x512xf32>
    %12 = arith.mulf %11, %5 : vector<16x512xf32>
    %13 = arith.truncf %12 : vector<16x512xf32> to vector<16x512xbf16>
    %c0_5 = arith.constant 0 : index
    %c0_6 = arith.constant 0 : index
    %c0_7 = arith.constant 0 : index
    %14 = vector.load %arg4[%c0_5, %c0_6, %c0_7] : memref<1x512x128xbf16, #tpu.memory_space<vmem>>, vector<1x512x128xbf16>
    %15 = vector.shape_cast %14 : vector<1x512x128xbf16> to vector<512x128xbf16>
    %cst_8 = arith.constant dense<0.000000e+00> : vector<16x128xf32>
    %16 = tpu.matmul %13, %15, %cst_8 {dimension_numbers = #tpu.dot_dimension_numbers<[1], [0], [0], [1], [0, 0, 1, 1], [], []>} : vector<16x512xbf16>, vector<512x128xbf16>, vector<16x128xf32> -> vector<16x128xf32>
    %c0_i32 = arith.constant 0 : i32
    %17 = arith.cmpi eq, %arg1, %c0_i32 : i32
    %18 = arith.extui %17 : i1 to i32
    %c0_i32_9 = arith.constant 0 : i32
    %19 = arith.cmpi ne, %18, %c0_i32_9 : i32
    scf.if %19 {
      %c0_14 = arith.constant 0 : index
      %c0_15 = arith.constant 0 : index
      %26 = vector.load %arg6[%c0_14, %c0_15] : memref<16x128xf32, #tpu.memory_space<vmem>>, vector<16x128xf32>
      tpu.vector_store %arg6[%c0_14, %c0_15], %16 {strides = array<i32>} : memref<16x128xf32, #tpu.memory_space<vmem>>, vector<16x128xf32>,
    } else {
    }
    %c0_i32_10 = arith.constant 0 : i32
    %20 = arith.cmpi sgt, %arg1, %c0_i32_10 : i32
    %21 = arith.extui %20 : i1 to i32
    %c0_i32_11 = arith.constant 0 : i32
    %22 = arith.cmpi ne, %21, %c0_i32_11 : i32
    scf.if %22 {
      %c0_14 = arith.constant 0 : index
      %c0_15 = arith.constant 0 : index
      %26 = vector.load %arg6[%c0_14, %c0_15] : memref<16x128xf32, #tpu.memory_space<vmem>>, vector<16x128xf32>
      %27 = arith.addf %26, %16 : vector<16x128xf32>
      %c0_16 = arith.constant 0 : index
      %c0_17 = arith.constant 0 : index
      %28 = vector.load %arg6[%c0_16, %c0_17] : memref<16x128xf32, #tpu.memory_space<vmem>>, vector<16x128xf32>
      tpu.vector_store %arg6[%c0_16, %c0_17], %27 {strides = array<i32>} : memref<16x128xf32, #tpu.memory_space<vmem>>, vector<16x128xf32>,
    } else {
    }
    %c0_i32_12 = arith.constant 0 : i32
    %23 = arith.cmpi eq, %arg1, %c0_i32_12 : i32
    %24 = arith.extui %23 : i1 to i32
    %c0_i32_13 = arith.constant 0 : i32
    %25 = arith.cmpi ne, %24, %c0_i32_13 : i32
    scf.if %25 {
      %c0_14 = arith.constant 0 : index
      %c0_15 = arith.constant 0 : index
      %26 = vector.load %arg6[%c0_14, %c0_15] : memref<16x128xf32, #tpu.memory_space<vmem>>, vector<16x128xf32>
      %c0_16 = arith.constant 0 : index
      %c0_17 = arith.constant 0 : index
      %27 = vector.load %arg5[%c0_16, %c0_17] : memref<16x128xf32, #tpu.memory_space<vmem>>, vector<16x128xf32>
      tpu.vector_store %arg5[%c0_16, %c0_17], %26 {strides = array<i32>} : memref<16x128xf32, #tpu.memory_space<vmem>>, vector<16x128xf32>,
    } else {
    }
    return
  }
  func.func @transform_0(%arg0: i32, %arg1: i32) -> (i32, i32) {
    %c0_i32 = arith.constant 0 : i32
    %c0_i32_0 = arith.constant 0 : i32
    return %arg0, %c0_i32 : i32, i32
  }
  func.func @transform_1(%arg0: i32, %arg1: i32) -> (i32, i32, i32) {
    %c0_i32 = arith.constant 0 : i32
    %c0_i32_0 = arith.constant 0 : i32
    %c0_i32_1 = arith.constant 0 : i32
    return %arg1, %c0_i32, %c0_i32_0 : i32, i32, i32
  }
  func.func @transform_2(%arg0: i32, %arg1: i32) -> (i32, i32, i32) {
    %c0_i32 = arith.constant 0 : i32
    %c0_i32_0 = arith.constant 0 : i32
    %c0_i32_1 = arith.constant 0 : i32
    return %arg1, %c0_i32, %c0_i32_0 : i32, i32, i32
  }
  func.func @transform_3(%arg0: i32, %arg1: i32) -> (i32, i32) {
    %c0_i32 = arith.constant 0 : i32
    %c0_i32_0 = arith.constant 0 : i32
    return %arg0, %c0_i32 : i32, i32
  }
}

</mosaic_0001>

<bundles_post_ra>
// kernel: feed_forward.1
= control target key start
LH: loop header
LB: loop body
LE: loop exit
PB: predicated region body
PF: predicated region fallthrough
CT: control target
= control target key end

     0   :  { %8 = vsyncpa [#allocation4], 0  ;;  %s1430_s0 = inlined_call_operand.vmem [shape: bf16[16,128], index: 0, kind: input, shape index: {}]   ;;  %s1431_s1 = inlined_call_operand.hbm [shape: bf16[1,128,1024], index: 1, kind: input, shape index: {}]   ;;  %s1432_s2 = inlined_call_operand.hbm [shape: bf16[1,512,128], index: 2, kind: input, shape index: {}]   ;;  %s1433_s3 = inlined_call_operand.hbm [shape: f32[16,128], index: 3, kind: output, shape index: {}]  }
   0x1   :  { %9 = vsyncpa [#allocation7], 0 }
   0x2   :  { %10 = vsyncpa [#allocation5], 0  ;;  %s1351_s12 = smov [#allocation3]   ;;  %s1279_s16 = scalar_lea.hbm %s1431_s1, 8192 }
   0x3   :  { %s18_s13 = sshll.u32 %s1351_s12, 4  ;;  %p1280_p0 = scmp.ne.s32.totalorder %s1431_s1, %s1279_s16  ;;  %s19_s13 = int_to_ptr.vmem [resolvable:$true] %s18_s13 }
   0x4   :  { %p1283_p1 = scmp.lt.u32.totalorder %s1279_s16, %s1431_s1 }
   0x6   :  { %p1285_p2 = pnand %p1283_p1, %p1280_p0 }
   0x8   :  { %1288 = shalt.err (!%p1285_p2)
}
   0x9   :  { %s1289_s21 = scalar_lea.vmem %s19_s13, 8192  ;;  %p1294_p4 = scmp.lt.s32.totalorder %s19_s13, %s19_s13 }
   0xa   :  { %p1290_p3 = scmp.ne.s32.totalorder %s19_s13, %s1289_s21  ;;  %p1295_p5 = scmp.lt.s32.totalorder %s1289_s21, %s1289_s21 }
   0xc   :  { %p1296_p6 = por %p1295_p5, %p1294_p4 }
   0xe   :  { %p1297_p7 = pnand %p1296_p6, %p1290_p3 }
  0x10   :  { %1300 = shalt.err (!%p1297_p7)
}
  0x11   :  { %s1352_s22 = smov 512   ;;  %s1353_s23 = smov 32  }
  0x12   :  { %24 = dma.hbm_to_vmem [thread:$0]  %s1431_s1, 8192, %s19_s13, [#allocation4], %s1352_s22, %s1352_s22, %s1353_s23  }
  0x13   :  { %s1354_s26 = smov [#allocation6]   ;;  %s1301_s30 = scalar_lea.hbm %s1432_s2, 4096 }
  0x14   :  { %s30_s27 = sshll.u32 %s1354_s26, 4  ;;  %p1302_p8 = scmp.ne.s32.totalorder %s1432_s2, %s1301_s30  ;;  %s31_s27 = int_to_ptr.vmem [resolvable:$true] %s30_s27 }
  0x15   :  { %p1305_p9 = scmp.lt.u32.totalorder %s1301_s30, %s1432_s2 }
  0x17   :  { %p1307_p10 = pnand %p1305_p9, %p1302_p8 }
  0x19   :  { %1310 = shalt.err (!%p1307_p10)
}
  0x1a   :  { %s1311_s8 = scalar_lea.vmem %s31_s27, 4096  ;;  %p1316_p12 = scmp.lt.s32.totalorder %s31_s27, %s31_s27 }
  0x1b   :  { %p1312_p11 = scmp.ne.s32.totalorder %s31_s27, %s1311_s8  ;;  %p1317_p13 = scmp.lt.s32.totalorder %s1311_s8, %s1311_s8 }
  0x1d   :  { %p1318_p0 = por %p1317_p13, %p1316_p12 }
  0x1f   :  { %p1319_p1 = pnand %p1318_p0, %p1312_p11 }
  0x21   :  { %1322 = shalt.err (!%p1319_p1)
}
  0x22   :  { %s1355_s1 = smov 64   ;;  %s1356_s9 = smov 4  }
  0x23   :  { %36 = dma.hbm_to_vmem [thread:$0]  %s1432_s2, 4096, %s31_s27, [#allocation7], %s1355_s1, %s1355_s1, %s1356_s9  }
  0x24   :  { %1345 = dma.done.wait [#allocation4], 8192  }
  0x25   :  { %1346 = vsyncadd [#allocation4], 4294959104 }
  0x26   :  { %1347 = dma.done.wait [#allocation7], 4096  }
  0x27   :  { %1348 = vsyncadd [#allocation7], 4294963200  ;;  %v1357_v0 = vmov 0   ;;  %v46_v1 = vld [vmem:[#allocation3] sm:$0xff]  ;;  %v47_v3 = vld [vmem:[#allocation3 + $0x8] sm:$0xff] }
  0x28   :  { %468 = vmatprep.mubr.bf16.mxu0 %v1357_v0  ;;  %511 = vmatprep.mubr.bf16.mxu1 %v1357_v0  ;;  %v50_v2 = vld [vmem:[#allocation3 + $0x20] sm:$0xff]  ;;  %v51_v5 = vld [vmem:[#allocation3 + $0x28] sm:$0xff]  ;;  %v48_v60 = vld [vmem:[#allocation3 + $0x10] sm:$0xff] }
  0x29   :  { %v1057_v4 = vcombine.high %v46_v1, %v50_v2  ;;  %v1056_v6 = vcombine.low %v46_v1, %v50_v2  ;;  %v54_v7 = vld [vmem:[#allocation3 + $0x40] sm:$0xff]  ;;  %v1059_v9 = vcombine.high %v47_v3, %v51_v5  ;;  %v1058_v10 = vcombine.low %v47_v3, %v51_v5  ;;  %v55_v12 = vld [vmem:[#allocation3 + $0x48] sm:$0xff]  ;;  %v52_v61 = vld [vmem:[#allocation3 + $0x30] sm:$0xff] }
  0x2a   :  { %v58_v8 = vld [vmem:[#allocation3 + $0x60] sm:$0xff]  ;;  %v59_v13 = vld [vmem:[#allocation3 + $0x68] sm:$0xff]  ;;  %v49_v1 = vld [vmem:[#allocation3 + $0x18] sm:$0xff] }
  0x2b   :  { %v1065_v11 = vcombine.high %v54_v7, %v58_v8  ;;  %v62_v14 = vld [vmem:[#allocation3 + $0x80] sm:$0xff]  ;;  %436 = vmatprep.subr.bf16.mxu0 %v1057_v4  ;;  %v1067_v15 = vcombine.high %v55_v12, %v59_v13  ;;  %v63_v17 = vld [vmem:[#allocation3 + $0x88] sm:$0xff]  ;;  %479 = vmatprep.subr.bf16.mxu1 %v1059_v9  ;;  %v1064_v19 = vcombine.low %v54_v7, %v58_v8  ;;  %v53_v2 = vld [vmem:[#allocation3 + $0x38] sm:$0xff] }
  0x2c   :  { %v66_v16 = vld [vmem:[#allocation3 + $0xa0] sm:$0xff]  ;;  %v67_v18 = vld [vmem:[#allocation3 + $0xa8] sm:$0xff]  ;;  %437 = vmatpush1.bf16.msra.mxu0 %v1056_v6  ;;  %480 = vmatpush1.bf16.msra.mxu1 %v1058_v10  ;;  %v1066_v20 = vcombine.low %v55_v12, %v59_v13  ;;  %v56_v5 = vld [vmem:[#allocation3 + $0x50] sm:$0xff]  ;;  %v1061_v9 = vcombine.high %v48_v60, %v52_v61  ;;  %v1063_v12 = vcombine.high %v49_v1, %v53_v2 }
  0x2d   :  { %438 = vmatprep.subr.bf16.mxu0 %v1065_v11  ;;  %v1073_v21 = vcombine.high %v62_v14, %v66_v16  ;;  %481 = vmatprep.subr.bf16.mxu1 %v1067_v15  ;;  %v1075_v22 = vcombine.high %v63_v17, %v67_v18  ;;  %v70_v23 = vld [vmem:[#allocation3 + $0xc0] sm:$0xff]  ;;  %v71_v25 = vld [vmem:[#allocation3 + $0xc8] sm:$0xff]  ;;  %v1072_v27 = vcombine.low %v62_v14, %v66_v16  ;;  %v60_v6 = vld [vmem:[#allocation3 + $0x70] sm:$0xff] }
  0x2e   :  { %v74_v24 = vld [vmem:[#allocation3 + $0xe0] sm:$0xff]  ;;  %v75_v26 = vld [vmem:[#allocation3 + $0xe8] sm:$0xff]  ;;  %v1074_v28 = vcombine.low %v63_v17, %v67_v18  ;;  %v57_v10 = vld [vmem:[#allocation3 + $0x58] sm:$0xff]  ;;  %v1060_v13 = vcombine.low %v48_v60, %v52_v61  ;;  %v1062_v16 = vcombine.low %v49_v1, %v53_v2  ;;  %v1069_v17 = vcombine.high %v56_v5, %v60_v6 }
  0x2f   :  { %v1081_v29 = vcombine.high %v70_v23, %v74_v24  ;;  %v1083_v30 = vcombine.high %v71_v25, %v75_v26  ;;  %v78_v31 = vld [vmem:[#allocation3 + $0x100] sm:$0xff]  ;;  %v79_v33 = vld [vmem:[#allocation3 + $0x108] sm:$0xff]  ;;  %v1080_v35 = vcombine.low %v70_v23, %v74_v24  ;;  %v1082_v36 = vcombine.low %v71_v25, %v75_v26  ;;  %v61_v11 = vld [vmem:[#allocation3 + $0x78] sm:$0xff] }
  0x30   :  { %439 = vmatpush1.bf16.msra.mxu0 %v1064_v19  ;;  %482 = vmatpush1.bf16.msra.mxu1 %v1066_v20  ;;  %v82_v32 = vld [vmem:[#allocation3 + $0x120] sm:$0xff]  ;;  %v83_v34 = vld [vmem:[#allocation3 + $0x128] sm:$0xff]  ;;  %v64_v14 = vld [vmem:[#allocation3 + $0x90] sm:$0xff]  ;;  %v1071_v20 = vcombine.high %v57_v10, %v61_v11  ;;  %v1070_v24 = vcombine.low %v57_v10, %v61_v11 }
  0x31   :  { %440 = vmatprep.subr.bf16.mxu0 %v1073_v21  ;;  %483 = vmatprep.subr.bf16.mxu1 %v1075_v22  ;;  %v1089_v37 = vcombine.high %v78_v31, %v82_v32  ;;  %v1091_v38 = vcombine.high %v79_v33, %v83_v34  ;;  %v86_v39 = vld [vmem:[#allocation3 + $0x140] sm:$0xff]  ;;  %v87_v41 = vld [vmem:[#allocation3 + $0x148] sm:$0xff]  ;;  %v1088_v43 = vcombine.low %v78_v31, %v82_v32  ;;  %v68_v15 = vld [vmem:[#allocation3 + $0xb0] sm:$0xff] }
  0x32   :  { %v90_v40 = vld [vmem:[#allocation3 + $0x160] sm:$0xff]  ;;  %v91_v42 = vld [vmem:[#allocation3 + $0x168] sm:$0xff]  ;;  %v1090_v44 = vcombine.low %v79_v33, %v83_v34  ;;  %v65_v18 = vld [vmem:[#allocation3 + $0x98] sm:$0xff]  ;;  %v1068_v21 = vcombine.low %v56_v5, %v60_v6  ;;  %v1077_v25 = vcombine.high %v64_v14, %v68_v15 }
  0x33   :  { %v1097_v45 = vcombine.high %v86_v39, %v90_v40  ;;  %v1099_v46 = vcombine.high %v87_v41, %v91_v42  ;;  %v94_v47 = vld [vmem:[#allocation3 + $0x180] sm:$0xff]  ;;  %v95_v49 = vld [vmem:[#allocation3 + $0x188] sm:$0xff]  ;;  %v1096_v51 = vcombine.low %v86_v39, %v90_v40  ;;  %v1098_v52 = vcombine.low %v87_v41, %v91_v42  ;;  %v69_v19 = vld [vmem:[#allocation3 + $0xb8] sm:$0xff] }
  0x34   :  { %441 = vmatpush1.bf16.msra.mxu0 %v1072_v27  ;;  %484 = vmatpush1.bf16.msra.mxu1 %v1074_v28  ;;  %v98_v48 = vld [vmem:[#allocation3 + $0x1a0] sm:$0xff]  ;;  %v99_v50 = vld [vmem:[#allocation3 + $0x1a8] sm:$0xff]  ;;  %v72_v22 = vld [vmem:[#allocation3 + $0xd0] sm:$0xff]  ;;  %v1079_v28 = vcombine.high %v65_v18, %v69_v19  ;;  %v1078_v32 = vcombine.low %v65_v18, %v69_v19 }
  0x35   :  { %442 = vmatprep.subr.bf16.mxu0 %v1081_v29  ;;  %485 = vmatprep.subr.bf16.mxu1 %v1083_v30  ;;  %v1105_v53 = vcombine.high %v94_v47, %v98_v48  ;;  %v102_v54 = vld [vmem:[#allocation3 + $0x1c0] sm:$0xff]  ;;  %v103_v56 = vld [vmem:[#allocation3 + $0x1c8] sm:$0xff]  ;;  %v1107_v57 = vcombine.high %v95_v49, %v99_v50  ;;  %v1104_v59 = vcombine.low %v94_v47, %v98_v48  ;;  %v76_v23 = vld [vmem:[#allocation3 + $0xf0] sm:$0xff] }
  0x36   :  { %v106_v55 = vld [vmem:[#allocation3 + $0x1e0] sm:$0xff]  ;;  %v107_v58 = vld [vmem:[#allocation3 + $0x1e8] sm:$0xff]  ;;  %v1106_v62 = vcombine.low %v95_v49, %v99_v50  ;;  %v73_v26 = vld [vmem:[#allocation3 + $0xd8] sm:$0xff]  ;;  %v1076_v29 = vcombine.low %v64_v14, %v68_v15  ;;  %v1085_v33 = vcombine.high %v72_v22, %v76_v23 }
  0x37   :  { %v1113_v63 = vcombine.high %v102_v54, %v106_v55  ;;  %v1115_v3 = vcombine.high %v103_v56, %v107_v58  ;;  %v1112_v4 = vcombine.low %v102_v54, %v106_v55  ;;  %v1114_v7 = vcombine.low %v103_v56, %v107_v58  ;;  %v1410_v8 = vld [vmem:[%s1430_s0] sm:$0xff]   ;;  %v77_v27 = vld [vmem:[#allocation3 + $0xf8] sm:$0xff]  ;;  %v80_v30 = vld [vmem:[#allocation3 + $0x110] sm:$0xff]  ;;  %s1358_s0 = smov [#allocation8]  }
  0x38   :  { %443 = vmatpush1.bf16.msra.mxu0 %v1080_v35  ;;  %486 = vmatpush1.bf16.msra.mxu1 %v1082_v36  ;;  %v84_v31 = vld [vmem:[#allocation3 + $0x130] sm:$0xff]  ;;  %v81_v34 = vld [vmem:[#allocation3 + $0x118] sm:$0xff]  ;;  %v1087_v35 = vcombine.high %v73_v26, %v77_v27  ;;  %v1217_v5 = vld [vmem:[#allocation6] sm:$0xff]   ;;  %s1042_s13 = sshll.u32 %s1358_s0, 4  ;;  %s1043_s13 = int_to_ptr.vmem [resolvable:$true] %s1042_s13 }
  0x39   :  { %444 = vmatprep.subr.bf16.mxu0 %v1089_v37  ;;  %487 = vmatprep.subr.bf16.mxu1 %v1091_v38  ;;  %v85_v36 = vld [vmem:[#allocation3 + $0x138] sm:$0xff]  ;;  %v1084_v37 = vcombine.low %v72_v22, %v76_v23  ;;  %v1086_v38 = vcombine.low %v73_v26, %v77_v27  ;;  %v1093_v39 = vcombine.high %v80_v30, %v84_v31  ;;  %v88_v40 = vld [vmem:[#allocation3 + $0x150] sm:$0xff]  ;;  %v1218_v6 = vld [vmem:[#allocation6 + $0x80] sm:$0xff]   ;;  %s1323_s14 = scalar_lea.vmem %s1043_s13, 256  ;;  %p1328_p3 = scmp.lt.s32.totalorder %s1043_s13, %s1043_s13 }
  0x3a   :  { %v92_v41 = vld [vmem:[#allocation3 + $0x170] sm:$0xff]  ;;  %v89_v42 = vld [vmem:[#allocation3 + $0x158] sm:$0xff]  ;;  %v1221_v10 = vld [vmem:[#allocation6 + $0x8] sm:$0xff]   ;;  %p1324_p2 = scmp.ne.s32.totalorder %s1043_s13, %s1323_s14  ;;  %p1329_p4 = scmp.lt.s32.totalorder %s1323_s14, %s1323_s14 }
  0x3b   :  { %v96_v48 = vld [vmem:[#allocation3 + $0x190] sm:$0xff]  ;;  %v97_v50 = vld [vmem:[#allocation3 + $0x198] sm:$0xff]  ;;  %v1222_v11 = vld [vmem:[#allocation6 + $0x88] sm:$0xff]  }
  0x3c   :  { %445 = vmatpush1.bf16.msra.mxu0 %v1088_v43  ;;  %488 = vmatpush1.bf16.msra.mxu1 %v1090_v44  ;;  %v93_v43 = vld [vmem:[#allocation3 + $0x178] sm:$0xff]  ;;  %v1092_v44 = vcombine.low %v80_v30, %v84_v31  ;;  %v100_v49 = vld [vmem:[#allocation3 + $0x1b0] sm:$0xff]  ;;  %v1231_v19 = vld [vmem:[#allocation6 + $0x60] sm:$0xff]   ;;  %p1330_p5 = por %p1329_p4, %p1328_p3 }
  0x3d   :  { %446 = vmatprep.subr.bf16.mxu0 %v1097_v45  ;;  %489 = vmatprep.subr.bf16.mxu1 %v1099_v46  ;;  %v1094_v45 = vcombine.low %v81_v34, %v85_v36  ;;  %v1101_v46 = vcombine.high %v88_v40, %v92_v41  ;;  %v1103_v47 = vcombine.high %v89_v42, %v93_v43  ;;  %v104_v56 = vld [vmem:[#allocation3 + $0x1d0] sm:$0xff]  ;;  %v105_v58 = vld [vmem:[#allocation3 + $0x1d8] sm:$0xff]  ;;  %v1234_v22 = vld [vmem:[#allocation6 + $0xa0] sm:$0xff]  }
  0x3e   :  { %v1109_v54 = vcombine.high %v96_v48, %v100_v49  ;;  %v1108_v60 = vcombine.low %v96_v48, %v100_v49  ;;  %v1225_v14 = vld [vmem:[#allocation6 + $0x10] sm:$0xff]   ;;  %v1227_v15 = vld [vmem:[#allocation6 + $0x58] sm:$0xff]   ;;  %v1235_v23 = vld [vmem:[#allocation6 + $0x68] sm:$0xff]   ;;  %p1331_p6 = pnand %p1330_p5, %p1324_p2 }
  0x3f   :  { %v1230_v18 = vld [vmem:[#allocation6 + $0x98] sm:$0xff]   ;;  %v1238_v26 = vld [vmem:[#allocation6 + $0xa8] sm:$0xff]   ;;  %v1239_v27 = vld [vmem:[#allocation6 + $0x70] sm:$0xff]  }
  0x40   :  { %447 = vmatpush1.bf16.msra.mxu0 %v1096_v51  ;;  %490 = vmatpush1.bf16.msra.mxu1 %v1098_v52  ;;  %v101_v51 = vld [vmem:[#allocation3 + $0x1b8] sm:$0xff]  ;;  %v1100_v52 = vcombine.low %v88_v40, %v92_v41  ;;  %v1242_v30 = vld [vmem:[#allocation6 + $0xb0] sm:$0xff]  }
  0x41   :  { %448 = vmatprep.subr.bf16.mxu0 %v1105_v53  ;;  %491 = vmatprep.subr.bf16.mxu1 %v1107_v57  ;;  %v1102_v53 = vcombine.low %v89_v42, %v93_v43  ;;  %v1111_v55 = vcombine.high %v97_v50, %v101_v51  ;;  %v108_v57 = vld [vmem:[#allocation3 + $0x1f0] sm:$0xff]  ;;  %v1110_v61 = vcombine.low %v97_v50, %v101_v51  ;;  %v1243_v31 = vld [vmem:[#allocation6 + $0x78] sm:$0xff]  }
  0x42   :  { %v1116_v1 = vcombine.low %v104_v56, %v108_v57 }
  0x44   :  { %449 = vmatpush1.bf16.msra.mxu0 %v1104_v59  ;;  %492 = vmatpush1.bf16.msra.mxu1 %v1106_v62  ;;  %v109_v59 = vld [vmem:[#allocation3 + $0x1f8] sm:$0xff]  ;;  %v1117_v62 = vcombine.high %v104_v56, %v108_v57 }
  0x45   :  { %450 = vmatprep.subr.bf16.mxu0 %v1113_v63  ;;  %493 = vmatprep.subr.bf16.mxu1 %v1115_v3  ;;  %v1119_v63 = vcombine.high %v105_v58, %v109_v59  ;;  %v1118_v2 = vcombine.low %v105_v58, %v109_v59  ;;  %v1215_v3 = vld [vmem:[#allocation6 + $0x40] sm:$0xff]  }
  0x48   :  { %451 = vmatpush1.bf16.msra.mxu0 %v1112_v4  ;;  %494 = vmatpush1.bf16.msra.mxu1 %v1114_v7  ;;  %v1216_v4 = vld [vmem:[#allocation6 + $0xc0] sm:$0xff]   ;;  %v1219_v7 = vld [vmem:[#allocation6 + $0x48] sm:$0xff]  }
  0x49   :  { %522 = vmatprep.subr.bf16.mxu0 %v1061_v9  ;;  %565 = vmatprep.subr.bf16.mxu1 %v1063_v12  ;;  %v1220_v9 = vld [vmem:[#allocation6 + $0xc8] sm:$0xff]   ;;  %v1223_v12 = vld [vmem:[#allocation6 + $0x50] sm:$0xff]  }
  0x4b   :  { %469 = vmatmul.mubr.bf16.vlgmr.msra.gmra.mrb[0].mxu0 %v1410_v8  ;;  %512 = vmatmul.mubr.bf16.vlgmr.msra.gmra.mrb[0].mxu1 %v1410_v8 }
  0x4c   :  { %523 = vmatpush1.bf16.msra.mxu0 %v1060_v13  ;;  %566 = vmatpush1.bf16.msra.mxu1 %v1062_v16  ;;  %v1224_v13 = vld [vmem:[#allocation6 + $0xd0] sm:$0xff]   ;;  %v1228_v16 = vld [vmem:[#allocation6 + $0xd8] sm:$0xff]  }
  0x4d   :  { %524 = vmatprep.subr.bf16.mxu0 %v1069_v17  ;;  %567 = vmatprep.subr.bf16.mxu1 %v1071_v20  ;;  %v1229_v17 = vld [vmem:[#allocation6 + $0x18] sm:$0xff]   ;;  %v1232_v20 = vld [vmem:[#allocation6 + $0xe0] sm:$0xff]  }
  0x4e   :  { %554 = vmatprep.mubr.bf16.mxu0 %v1357_v0  ;;  %597 = vmatprep.mubr.bf16.mxu1 %v1357_v0  ;;  %v1095_v0 = vcombine.high %v81_v34, %v85_v36  ;;  %v1246_v34 = vld [vmem:[#allocation6 + $0xb8] sm:$0xff]  }
  0x50   :  { %525 = vmatpush1.bf16.msra.mxu0 %v1068_v21  ;;  %568 = vmatpush1.bf16.msra.mxu1 %v1070_v24  ;;  %v1233_v21 = vld [vmem:[#allocation6 + $0x20] sm:$0xff]   ;;  %v1236_v24 = vld [vmem:[#allocation6 + $0xe8] sm:$0xff]  }
  0x51   :  { %526 = vmatprep.subr.bf16.mxu0 %v1077_v25  ;;  %569 = vmatprep.subr.bf16.mxu1 %v1079_v28  ;;  %v1237_v25 = vld [vmem:[#allocation6 + $0x28] sm:$0xff]   ;;  %v1240_v28 = vld [vmem:[#allocation6 + $0xf0] sm:$0xff]  }
  0x54   :  { %527 = vmatpush1.bf16.msra.mxu0 %v1076_v29  ;;  %570 = vmatpush1.bf16.msra.mxu1 %v1078_v32  ;;  %v1241_v29 = vld [vmem:[#allocation6 + $0x30] sm:$0xff]   ;;  %v1244_v32 = vld [vmem:[#allocation6 + $0xf8] sm:$0xff]  }
  0x55   :  { %528 = vmatprep.subr.bf16.mxu0 %v1085_v33  ;;  %571 = vmatprep.subr.bf16.mxu1 %v1087_v35  ;;  %v1245_v33 = vld [vmem:[#allocation6 + $0x38] sm:$0xff]  }
  0x58   :  { %529 = vmatpush1.bf16.msra.mxu0 %v1084_v37  ;;  %572 = vmatpush1.bf16.msra.mxu1 %v1086_v38 }
  0x59   :  { %530 = vmatprep.subr.bf16.mxu0 %v1093_v39  ;;  %573 = vmatprep.subr.bf16.mxu1 %v1095_v0 }
  0x5c   :  { %531 = vmatpush1.bf16.msra.mxu0 %v1092_v44  ;;  %574 = vmatpush1.bf16.msra.mxu1 %v1094_v45 }
  0x5d   :  { %532 = vmatprep.subr.bf16.mxu0 %v1101_v46  ;;  %575 = vmatprep.subr.bf16.mxu1 %v1103_v47 }
  0x60   :  { %533 = vmatpush1.bf16.msra.mxu0 %v1100_v52  ;;  %576 = vmatpush1.bf16.msra.mxu1 %v1102_v53 }
  0x61   :  { %534 = vmatprep.subr.bf16.mxu0 %v1109_v54  ;;  %577 = vmatprep.subr.bf16.mxu1 %v1111_v55 }
  0x64   :  { %535 = vmatpush1.bf16.msra.mxu0 %v1108_v60  ;;  %578 = vmatpush1.bf16.msra.mxu1 %v1110_v61 }
  0x65   :  { %536 = vmatprep.subr.bf16.mxu0 %v1117_v62  ;;  %579 = vmatprep.subr.bf16.mxu1 %v1119_v63 }
  0x68   :  { %537 = vmatpush1.bf16.msra.mxu0 %v1116_v1  ;;  %580 = vmatpush1.bf16.msra.mxu1 %v1118_v2 }
  0x69   :  { %1160 = vmatprep.subr.bf16.mxu0 %v1215_v3  ;;  %1182 = vmatprep.subr.bf16.mxu1 %v1216_v4 }
  0x6b   :  { %555 = vmatmul.mubr.bf16.vlgmr.msra.gmra.mrb[4].mxu0 %v1410_v8  ;;  %598 = vmatmul.mubr.bf16.vlgmr.msra.gmra.mrb[4].mxu1 %v1410_v8  ;;  %v1226_v8 = vld [vmem:[#allocation6 + $0x90] sm:$0xff]  }
  0x6c   :  { %1161 = vmatpush3.bf16.msra.mxu0 %v1217_v5  ;;  %1183 = vmatpush3.bf16.msra.mxu1 %v1218_v6 }
  0x6d   :  { %1162 = vmatprep.subr.bf16.mxu0 %v1219_v7  ;;  %1184 = vmatprep.subr.bf16.mxu1 %v1220_v9 }
  0x70   :  { %1163 = vmatpush3.bf16.msra.mxu0 %v1221_v10  ;;  %1185 = vmatpush3.bf16.msra.mxu1 %v1222_v11 }
  0x71   :  { %1164 = vmatprep.subr.bf16.mxu0 %v1223_v12  ;;  %1186 = vmatprep.subr.bf16.mxu1 %v1224_v13 }
  0x74   :  { %1165 = vmatpush3.bf16.msra.mxu0 %v1225_v14  ;;  %1187 = vmatpush3.bf16.msra.mxu1 %v1226_v8 }
  0x75   :  { %1166 = vmatprep.subr.bf16.mxu0 %v1227_v15  ;;  %1188 = vmatprep.subr.bf16.mxu1 %v1228_v16 }
  0x78   :  { %1167 = vmatpush3.bf16.msra.mxu0 %v1229_v17  ;;  %1189 = vmatpush3.bf16.msra.mxu1 %v1230_v18 }
  0x79   :  { %1168 = vmatprep.subr.bf16.mxu0 %v1231_v19  ;;  %1190 = vmatprep.subr.bf16.mxu1 %v1232_v20 }
  0x7c   :  { %1169 = vmatpush3.bf16.msra.mxu0 %v1233_v21  ;;  %1191 = vmatpush3.bf16.msra.mxu1 %v1234_v22 }
  0x7d   :  { %1170 = vmatprep.subr.bf16.mxu0 %v1235_v23  ;;  %1192 = vmatprep.subr.bf16.mxu1 %v1236_v24 }
  0x80   :  { %1171 = vmatpush3.bf16.msra.mxu0 %v1237_v25  ;;  %1193 = vmatpush3.bf16.msra.mxu1 %v1238_v26 }
  0x81   :  { %1172 = vmatprep.subr.bf16.mxu0 %v1239_v27  ;;  %1194 = vmatprep.subr.bf16.mxu1 %v1240_v28 }
  0x84   :  { %1173 = vmatpush3.bf16.msra.mxu0 %v1241_v29  ;;  %1195 = vmatpush3.bf16.msra.mxu1 %v1242_v30 }
  0x85   :  { %1174 = vmatprep.subr.bf16.mxu0 %v1243_v31  ;;  %1196 = vmatprep.subr.bf16.mxu1 %v1244_v32 }
  0x88   :  { %1175 = vmatpush3.bf16.msra.mxu0 %v1245_v33  ;;  %1197 = vmatpush3.bf16.msra.mxu1 %v1246_v34 }
 0x11e   :  { %v470_v35 = vpop.f32.mrb[0].mxu0  ;;  %v513_v37 = vpop.f32.mrb[0].mxu1 }
 0x11f   :  { %v1120_v36 = vmul.f32 -1.442695, %v470_v35  ;;  %v472_v38 = vpop.f32.mrb[1].mxu0  ;;  %v1122_v39 = vmul.f32 -1.442695, %v513_v37  ;;  %v515_v40 = vpop.f32.mrb[1].mxu1 }
 0x120   :  { %v1121_v0 = vmul.f32 -1.442695, %v472_v38  ;;  %v474_v41 = vpop.f32.mrb[2].mxu0  ;;  %v1123_v42 = vmul.f32 -1.442695, %v515_v40  ;;  %v517_v44 = vpop.f32.mrb[2].mxu1 }
 0x121   :  { %1247 = vpow2.f32 %v1120_v36  ;;  %v1124_v43 = vmul.f32 -1.442695, %v474_v41  ;;  %v476_v45 = vpop.f32.mrb[3].mxu0  ;;  %v1126_v46 = vmul.f32 -1.442695, %v517_v44  ;;  %v519_v47 = vpop.f32.mrb[3].mxu1 }
 0x122   :  { %1249 = vpow2.f32 %v1122_v39  ;;  %v1125_v48 = vmul.f32 -1.442695, %v476_v45  ;;  %v1127_v49 = vmul.f32 -1.442695, %v519_v47 }
 0x123   :  { %1251 = vpow2.f32 %v1121_v0 }
 0x124   :  { %1253 = vpow2.f32 %v1123_v42 }
 0x125   :  { %1255 = vpow2.f32 %v1124_v43 }
 0x126   :  { %1257 = vpow2.f32 %v1126_v46 }
 0x127   :  { %1259 = vpow2.f32 %v1125_v48 }
 0x128   :  { %1261 = vpow2.f32 %v1127_v49 }
 0x12b   :  { %v1248_v50 = vpop.eup %1247 }
 0x12c   :  { %v1250_v51 = vpop.eup %1249  ;;  %v632_v52 = vadd.f32 1.0, %v1248_v50 }
 0x12d   :  { %v1252_v53 = vpop.eup %1251  ;;  %v634_v54 = vadd.f32 1.0, %v1250_v51 }
 0x12e   :  { %v1254_v55 = vpop.eup %1253  ;;  %1263 = vrcp.f32 %v632_v52  ;;  %v633_v56 = vadd.f32 1.0, %v1252_v53 }
 0x12f   :  { %v1256_v57 = vpop.eup %1255  ;;  %1265 = vrcp.f32 %v634_v54  ;;  %v635_v58 = vadd.f32 1.0, %v1254_v55 }
 0x130   :  { %v1258_v59 = vpop.eup %1257  ;;  %1267 = vrcp.f32 %v633_v56  ;;  %v636_v60 = vadd.f32 1.0, %v1256_v57 }
 0x131   :  { %v1260_v61 = vpop.eup %1259  ;;  %1269 = vrcp.f32 %v635_v58  ;;  %v638_v62 = vadd.f32 1.0, %v1258_v59 }
 0x132   :  { %v1262_v63 = vpop.eup %1261  ;;  %1271 = vrcp.f32 %v636_v60  ;;  %v637_v1 = vadd.f32 1.0, %v1260_v61 }
 0x133   :  { %1273 = vrcp.f32 %v638_v62  ;;  %v639_v2 = vadd.f32 1.0, %v1262_v63 }
 0x134   :  { %1275 = vrcp.f32 %v637_v1 }
 0x135   :  { %1277 = vrcp.f32 %v639_v2 }
 0x138   :  { %v1264_v3 = vpop.eup %1263 }
 0x139   :  { %v1266_v4 = vpop.eup %1265  ;;  %v656_v10 = vmul.f32 %v1264_v3, %v470_v35 }
 0x13a   :  { %v1268_v5 = vpop.eup %1267  ;;  %v658_v12 = vmul.f32 %v1266_v4, %v513_v37 }
 0x13b   :  { %v1270_v6 = vpop.eup %1269  ;;  %v657_v13 = vmul.f32 %v1268_v5, %v472_v38 }
 0x13c   :  { %v1272_v7 = vpop.eup %1271  ;;  %v659_v15 = vmul.f32 %v1270_v6, %v515_v40 }
 0x13d   :  { %v1274_v9 = vpop.eup %1273  ;;  %v660_v16 = vmul.f32 %v1272_v7, %v474_v41 }
 0x13e   :  { %v1276_v11 = vpop.eup %1275  ;;  %v556_v14 = vpop.f32.mrb[4].mxu0  ;;  %v662_v20 = vmul.f32 %v1274_v9, %v517_v44 }
 0x13f   :  { %v1278_v8 = vpop.eup %1277  ;;  %v664_v17 = vmul.f32 %v656_v10, %v556_v14  ;;  %v599_v18 = vpop.f32.mrb[4].mxu1  ;;  %v661_v21 = vmul.f32 %v1276_v11, %v476_v45 }
 0x140   :  { %v558_v19 = vpop.f32.mrb[5].mxu0  ;;  %v666_v22 = vmul.f32 %v658_v12, %v599_v18  ;;  %v601_v24 = vpop.f32.mrb[5].mxu1  ;;  %v663_v26 = vmul.f32 %v1278_v8, %v519_v47 }
 0x141   :  { %v665_v23 = vmul.f32 %v657_v13, %v558_v19  ;;  %v560_v25 = vpop.f32.mrb[6].mxu0  ;;  %v667_v27 = vmul.f32 %v659_v15, %v601_v24  ;;  %v603_v29 = vpop.f32.mrb[6].mxu1 }
 0x142   :  { %v668_v28 = vmul.f32 %v660_v16, %v560_v25  ;;  %v562_v30 = vpop.f32.mrb[7].mxu0  ;;  %v670_v31 = vmul.f32 %v662_v20, %v603_v29  ;;  %v605_v33 = vpop.f32.mrb[7].mxu1 }
 0x143   :  { %v669_v32 = vmul.f32 %v661_v21, %v562_v30  ;;  %v671_v35 = vmul.f32 %v663_v26, %v605_v33 }
 0x144   :  { %v672_v34 = vpack.c.bf16 %v668_v28, %v664_v17  ;;  %v674_v36 = vpack.c.bf16 %v670_v31, %v666_v22 }
 0x145   :  { %v673_v37 = vpack.c.bf16 %v669_v32, %v665_v23  ;;  %v675_v38 = vpack.c.bf16 %v671_v35, %v667_v27 }
 0x147   :  { %964 = vmatprep.mubr.bf16.mxu0 %v673_v37  ;;  %1005 = vmatprep.mubr.bf16.mxu1 %v675_v38 }
 0x148   :  { %965 = vmatmul.mubr.bf16.vlgmr.msra.gmra.mrb[8].mxu0 %v672_v34  ;;  %1006 = vmatmul.mubr.bf16.vlgmr.msra.gmra.mrb[8].mxu1 %v674_v36 }
 0x21b   :  { %v1176_v39 = vpop.f32.mrb[8].mxu0  ;;  %v1198_v0 = vpop.f32.mrb[8].mxu1 }
 0x21c   :  { %v1177_v40 = vpop.f32.mrb[9].mxu0  ;;  %v1199_v42 = vpop.f32.mrb[9].mxu1 }
 0x21d   :  { %v1178_v41 = vadd.f32 %v1177_v40, %v1176_v39  ;;  %v1179_v43 = vpop.f32.mrb[10].mxu0  ;;  %v1200_v44 = vadd.f32 %v1199_v42, %v1198_v0  ;;  %v1201_v45 = vpop.f32.mrb[10].mxu1 }
 0x21e   :  { %v1180_v46 = vpop.f32.mrb[11].mxu0  ;;  %v1202_v48 = vpop.f32.mrb[11].mxu1 }
 0x21f   :  { %v1181_v47 = vadd.f32 %v1180_v46, %v1179_v43  ;;  %v1008_v49 = vadd.f32 %v1200_v44, %v1178_v41  ;;  %v1203_v50 = vadd.f32 %v1202_v48, %v1201_v45 }
 0x221   :  { %1035 = vst [vmem:[#allocation8] sm:$0xff] %v1008_v49  ;;  %v1011_v51 = vadd.f32 %v1203_v50, %v1181_v47 }
 0x223   :  { %1036 = vst [vmem:[#allocation8 + $0x8] sm:$0xff] %v1011_v51 }
 0x224   :  { %1334 = shalt.err (!%p1331_p6)
}
 0x225   :  { %s1335_s17 = scalar_lea.hbm %s1433_s3, 256 }
 0x226   :  { %p1336_p7 = scmp.ne.s32.totalorder %s1433_s3, %s1335_s17  ;;  %p1339_p8 = scmp.lt.u32.totalorder %s1335_s17, %s1433_s3 }
 0x228   :  { %p1341_p9 = pnand %p1339_p8, %p1336_p7 }
 0x22a   :  { %1344 = shalt.err (!%p1341_p9)
}
 0x22b   :  { %s1359_s22 = smov 128   ;;  %s1360_s23 = smov 8  }
 0x22c   :  { %1048 = dma.vmem_to_hbm [thread:$0]  %s1043_s13, 256, %s1433_s3, [#allocation5], %s1359_s22, %s1359_s22, %s1360_s23  }
 0x22d   :  { %1349 = dma.done.wait [#allocation5], 256  }
 0x22e   :  { %1350 = vsyncadd [#allocation5], 4294967040 }
 0x22f   :  { %1052 = vsyncpa [#allocation4], 1 }
 0x230   :  { %1053 = vsyncpa [#allocation7], 1 }
 0x231   :  { %1054 = vsyncpa [#allocation5], 1 }

</bundles_post_ra>
